<compile_context>
chip_gen: v6e
topology: v6e:2x2x1
jax: 0.10.0
libtpu: 0.0.40
codegen_flags: <defaults>
</compile_context>

<pallas_src>
import functools
import math

import jax
import jax.numpy as jnp
from jax.experimental import pallas as pl
from jax.experimental.pallas import tpu as pltpu

_LOG_2PI = math.log(2.0 * math.pi)
_LANE = 128


def _elbo_kernel(consts_ref, xs_ref, xsr_ref, z_ref, mu_ref, std_ref,
                 recon_ref, kld_ref, acc_ref, *, nk, tg, n_groups, need_mask):
    """Grid (B, nk); B is "parallel", the N-reduction axis is last/"arbitrary".

    Each step streams one (1, tg, sub, 128) tile of x_s / x_s_recon for batch b
    and accumulates squared residuals element-wise into an (sub, 128) f32 VMEM
    scratch.  k == 0 also computes the O(D) KL for this batch row; k == nk-1
    does the single cross-lane reduce plus the hoisted-constant finalize of the
    Gaussian log-likelihood."""
    # Only top-level program_id (nested-in-when program_id failed to lower).
    k = pl.program_id(1)

    @pl.when(k == 0)
    def _init():
        acc_ref[...] = jnp.zeros_like(acc_ref)
        # KL( N(mu, std) || N(0, 1) ) = log q(z) - log p(z); the two
        # -0.5*log(2*pi) terms cancel exactly.  O(D) work, once per batch.
        z = z_ref[...].astype(jnp.float32)        # (1, 1, D)
        mu = mu_ref[...].astype(jnp.float32)
        std = std_ref[...].astype(jnp.float32)
        zd = z - mu
        kl = 0.5 * (z * z) - (zd * zd) * (0.5 / (std * std)) - jnp.log(std)
        kld_ref[...] = jnp.sum(kl, axis=-1, keepdims=True)    # (1, 1, 1)

    # ---- dominant HBM stream: squared residuals of this tile ---------------
    x = xs_ref[...].astype(jnp.float32)           # (1, tg, sub, 128)
    mean = xsr_ref[...].astype(jnp.float32)
    d = x - mean
    sq = d * d
    if need_mask:
        # Ragged last tile: groups past the true extent hold undefined data;
        # mask them out (the true extent is sublane-group aligned, so masking
        # at group granularity is exact).  Static flag -> no code otherwise.
        grp = jax.lax.broadcasted_iota(jnp.int32, sq.shape, 1) + k * tg
        sq = jnp.where(grp < n_groups, sq, 0.0)
    # Pure element-wise vreg adds into the resident scratch accumulator.
    acc_ref[...] += jnp.sum(sq, axis=(0, 1))

    @pl.when(k == nk - 1)
    def _finalize():
        inv_two_var = consts_ref[0]     # 1 / (2 * exp(log_scale)^2)
        const_off = consts_ref[1]       # -N * (log_scale + 0.5*log(2*pi))
        total = jnp.sum(acc_ref[...], keepdims=True)           # (1, 1)
        recon_ref[...] = (const_off - total * inv_two_var).reshape(1, 1, 1)


def elbo_loss(x_m, x_m_recon, x_s, x_s_recon, timbre_latent, tau_mu, tau_std,
              log_scale, *, max_tile_rows=None):
    """Pallas implementation of ELBOLoss.forward.

    x_m / x_m_recon are accepted (to match the PyTorch signature) but unused,
    exactly as in the reference module.  `max_tile_rows` optionally caps the
    streaming tile (in 128-lane rows); default is a ~2 MiB-per-input tile.
    """
    del x_m, x_m_recon  # unused in the reference forward
    B = x_s.shape[0]
    N = 1
    for s in x_s.shape[1:]:
        N *= int(s)
    D = timbre_latent.shape[-1]

    itemsize = jnp.dtype(x_s.dtype).itemsize
    sub = max(8, 32 // itemsize)                  # f32 -> 8, bf16 -> 16, int8 -> 32
    rows = pl.cdiv(N, _LANE)
    arr_rows = ((rows + sub - 1) // sub) * sub    # sublane-group aligned rows

    xs = x_s.reshape(B, N)
    xsr = x_s_recon.reshape(B, N)
    if arr_rows * _LANE != N:
        # Uncommon fallback (N not lane/sublane-group aligned): zero-pad both
        # operands identically so the padded residuals are exactly zero (one
        # extra HBM pass).  The aligned common case below is copy-free: all
        # reshapes are metadata-only.
        pad = ((0, 0), (0, arr_rows * _LANE - N))
        xs = jnp.pad(xs, pad)
        xsr = jnp.pad(xsr, pad)
    n_groups = arr_rows // sub                    # 4 KiB sublane-groups / batch
    xs = xs.reshape(B, n_groups, sub, _LANE)
    xsr = xsr.reshape(B, n_groups, sub, _LANE)

    # ~2 MiB per input tile (512 groups x 4 KiB); with default double buffering
    # that is ~8 MiB of VMEM -- safe everywhere with the 32 MiB scoped limit.
    budget_groups = (2 * 1024 * 1024) // (sub * _LANE * itemsize)
    if max_tile_rows is not None:
        budget_groups = min(budget_groups, max(1, max_tile_rows // sub))
    tg = max(1, min(n_groups, budget_groups))
    nk = pl.cdiv(n_groups, tg)
    need_mask = (nk * tg != n_groups)

    # Hoisted scalar constants:
    #   recon_b = -sum_b((x - mean)^2)/(2*var) - N*(log_scale + 0.5*log(2*pi))
    # N*0.5*log(2*pi) is computed in float64 and rounded to f32 exactly once.
    ls = jnp.asarray(log_scale, jnp.float32).reshape(())
    inv_two_var = 0.5 * jnp.exp(-2.0 * ls)
    const_off = -(ls * N) - jnp.float32(0.5 * _LOG_2PI * N)
    consts = jnp.stack([inv_two_var, const_off])  # (2,) f32, lives in SMEM

    z = timbre_latent.reshape(B, 1, D)
    mu = tau_mu.reshape(B, 1, D)
    std = tau_std.reshape(B, 1, D)

    kernel = functools.partial(_elbo_kernel, nk=nk, tg=tg, n_groups=n_groups,
                               need_mask=need_mask)
    recon, kld = pl.pallas_call(
        kernel,
        grid=(B, nk),
        in_specs=[
            pl.BlockSpec(memory_space=pltpu.SMEM),                         # consts
            pl.BlockSpec((1, tg, sub, _LANE), lambda b, k: (b, k, 0, 0)),  # x_s
            pl.BlockSpec((1, tg, sub, _LANE), lambda b, k: (b, k, 0, 0)),  # x_s_recon
            pl.BlockSpec((1, 1, D), lambda b, k: (b, 0, 0)),               # z
            pl.BlockSpec((1, 1, D), lambda b, k: (b, 0, 0)),               # tau_mu
            pl.BlockSpec((1, 1, D), lambda b, k: (b, 0, 0)),               # tau_std
        ],
        out_specs=(pl.BlockSpec((1, 1, 1), lambda b, k: (b, 0, 0)),
                   pl.BlockSpec((1, 1, 1), lambda b, k: (b, 0, 0))),
        out_shape=(jax.ShapeDtypeStruct((B, 1, 1), jnp.float32),
                   jax.ShapeDtypeStruct((B, 1, 1), jnp.float32)),
        scratch_shapes=[pltpu.VMEM((sub, _LANE), jnp.float32)],
        compiler_params=pltpu.CompilerParams(
            dimension_semantics=("parallel", "arbitrary"),
            vmem_limit_bytes=32 * 1024 * 1024),
        cost_estimate=pl.CostEstimate(
            flops=int(4 * B * n_groups * sub * _LANE + 10 * B * D),
            transcendentals=int(B * D),
            bytes_accessed=int(2 * B * n_groups * sub * _LANE * itemsize)),
    )(consts, xs, xsr, z, mu, std)

    recon = recon[:, 0, 0]   # (B,) per-batch reconstruction log-likelihood
    kld = kld[:, 0, 0]       # (B,) per-batch KL
    # Tiny scalar epilogue: mean(kld - recon) == mean(kld) - mean(recon).
    sum_r = jnp.sum(recon)
    sum_k = jnp.sum(kld)
    inv_b = 1.0 / B
    return {'loss': (sum_k - sum_r) * inv_b,
            'recon_x': sum_r * inv_b,
            'kld': sum_k * inv_b}


def _reference(x_s, x_s_recon, z, mu, std, log_scale):
    """Pure-JAX reference mirroring the PyTorch module."""
    ls = log_scale.reshape(())
    scale = jnp.exp(ls)
    var = scale * scale
    log_pxz = -((x_s - x_s_recon) ** 2) / (2.0 * var) - ls - 0.5 * _LOG_2PI
    recon = jnp.sum(log_pxz, axis=tuple(range(1, x_s.ndim)))
    log_q = -((z - mu) ** 2) / (2.0 * std * std) - jnp.log(std) - 0.5 * _LOG_2PI
    log_p = -(z * z) / 2.0 - 0.5 * _LOG_2PI
    kld = jnp.sum(log_q - log_p, axis=-1)
    return {'loss': jnp.mean(kld - recon),
            'recon_x': jnp.mean(recon),
            'kld': jnp.mean(kld)}


def _run_case(key, shape, D, **kwargs):
    B = shape[0]
    ks = jax.random.split(key, 7)
    x_m = jax.random.normal(ks[0], shape, jnp.float32)
    x_m_recon = jax.random.normal(ks[1], shape, jnp.float32)
    x_s = jax.random.normal(ks[2], shape, jnp.float32)
    x_s_recon = jax.random.normal(ks[3], shape, jnp.float32)
    timbre_latent = jax.random.normal(ks[4], (B, D), jnp.float32)
    tau_mu = jax.random.normal(ks[5], (B, D), jnp.float32)
    tau_std = jax.nn.softplus(jax.random.normal(ks[6], (B, D), jnp.float32)) + 1e-3
    # nn.Parameter(torch.Tensor([0.0])) -> deterministic init of log_scale.
    log_scale = jnp.zeros((1,), jnp.float32)

    out = elbo_loss(x_m, x_m_recon, x_s, x_s_recon,
                    timbre_latent, tau_mu, tau_std, log_scale, **kwargs)
    out = jax.tree_util.tree_map(jax.block_until_ready, out)
    ref = _reference(x_s, x_s_recon, timbre_latent, tau_mu, tau_std, log_scale)
    for name in ('loss', 'recon_x', 'kld'):
        assert jnp.allclose(out[name], ref[name], rtol=1e-4, atol=1e-4), (
            name, out[name], ref[name])


if __name__ == "__main__":
    key = jax.random.PRNGKey(0)
    k1, k2, k3 = jax.random.split(key, 3)
    # Primary case: lane/sublane aligned, single reduction step per batch.
    _run_case(k1, (2, 4, 16, 16), 32)
    # Multi-step reduction with a ragged (in-kernel masked) last tile, no pad.
    _run_case(k2, (2, 4, 16, 48), 32, max_tile_rows=16)
    # Unaligned N -> zero-pad fallback path.
    _run_case(k3, (2, 3, 10, 10), 32)
    print("KERNEL_OK")
</pallas_src>

<mosaic_0001>
module attributes {stable_mosaic.version = 11 : i64} {
  func.func @_elbo_kernel(%arg0: i32, %arg1: i32, %arg2: memref<2xf32, #tpu.memory_space<smem>>, %arg3: memref<1x1x8x128xf32, #tpu.memory_space<vmem>>, %arg4: memref<1x1x8x128xf32, #tpu.memory_space<vmem>>, %arg5: memref<1x1x32xf32, #tpu.memory_space<vmem>>, %arg6: memref<1x1x32xf32, #tpu.memory_space<vmem>>, %arg7: memref<1x1x32xf32, #tpu.memory_space<vmem>>, %arg8: memref<1x1x1xf32, #tpu.memory_space<vmem>>, %arg9: memref<1x1x1xf32, #tpu.memory_space<vmem>>, %arg10: memref<8x128xf32, #tpu.memory_space<vmem>>) attributes {dimension_semantics = [#tpu.dimension_semantics<parallel>, #tpu.dimension_semantics<arbitrary>], iteration_bounds = array<i64: 2, 1>, scalar_prefetch = 0 : i64, scratch_operands = 1 : i64, tpu.core_type = #tpu.core_type<tc>, window_params = [{transform_indices = @transform_0, window_bounds = array<i64: 2>}, {transform_indices = @transform_1, window_bounds = array<i64: 1, 1, 8, 128>}, {transform_indices = @transform_2, window_bounds = array<i64: 1, 1, 8, 128>}, {transform_indices = @transform_3, window_bounds = array<i64: 1, 1, 32>}, {transform_indices = @transform_4, window_bounds = array<i64: 1, 1, 32>}, {transform_indices = @transform_5, window_bounds = array<i64: 1, 1, 32>}, {transform_indices = @transform_6, window_bounds = array<i64: 1, 1, 1>}, {transform_indices = @transform_7, window_bounds = array<i64: 1, 1, 1>}]} {
    %c0_i32 = arith.constant 0 : i32
    %0 = arith.cmpi eq, %arg1, %c0_i32 : i32
    %1 = arith.extui %0 : i1 to i32
    %c0_i32_0 = arith.constant 0 : i32
    %2 = arith.cmpi ne, %1, %c0_i32_0 : i32
    scf.if %2 {
      %cst_14 = arith.constant 0.000000e+00 : f32
      %14 = vector.broadcast %cst_14 : f32 to vector<8x128xf32>
      %c0_15 = arith.constant 0 : index
      %c0_16 = arith.constant 0 : index
      %15 = vector.load %arg10[%c0_15, %c0_16] : memref<8x128xf32, #tpu.memory_space<vmem>>, vector<8x128xf32>
      tpu.vector_store %arg10[%c0_15, %c0_16], %14 {strides = array<i32>} : memref<8x128xf32, #tpu.memory_space<vmem>>, vector<8x128xf32>,
      %c0_17 = arith.constant 0 : index
      %c0_18 = arith.constant 0 : index
      %c0_19 = arith.constant 0 : index
      %16 = vector.load %arg5[%c0_17, %c0_18, %c0_19] : memref<1x1x32xf32, #tpu.memory_space<vmem>>, vector<1x1x32xf32>
      %c0_20 = arith.constant 0 : index
      %c0_21 = arith.constant 0 : index
      %c0_22 = arith.constant 0 : index
      %17 = vector.load %arg6[%c0_20, %c0_21, %c0_22] : memref<1x1x32xf32, #tpu.memory_space<vmem>>, vector<1x1x32xf32>
      %c0_23 = arith.constant 0 : index
      %c0_24 = arith.constant 0 : index
      %c0_25 = arith.constant 0 : index
      %18 = vector.load %arg7[%c0_23, %c0_24, %c0_25] : memref<1x1x32xf32, #tpu.memory_space<vmem>>, vector<1x1x32xf32>
      %19 = arith.subf %16, %17 : vector<1x1x32xf32>
      %20 = arith.mulf %16, %16 : vector<1x1x32xf32>
      %cst_26 = arith.constant 5.000000e-01 : f32
      %21 = vector.broadcast %cst_26 : f32 to vector<1x1x32xf32>
      %22 = arith.mulf %21, %20 : vector<1x1x32xf32>
      %23 = arith.mulf %19, %19 : vector<1x1x32xf32>
      %24 = arith.mulf %18, %18 : vector<1x1x32xf32>
      %cst_27 = arith.constant 5.000000e-01 : f32
      %25 = vector.broadcast %cst_27 : f32 to vector<1x1x32xf32>
      %26 = arith.divf %25, %24 : vector<1x1x32xf32>
      %27 = arith.mulf %23, %26 : vector<1x1x32xf32>
      %28 = arith.subf %22, %27 : vector<1x1x32xf32>
      %29 = math.log %18 : vector<1x1x32xf32>
      %30 = arith.subf %28, %29 : vector<1x1x32xf32>
      %cst_28 = arith.constant dense<0.000000e+00> : vector<1x1xf32>
      %31 = vector.multi_reduction <add>, %30, %cst_28 [2] : vector<1x1x32xf32> to vector<1x1xf32>
      %32 = vector.shape_cast %31 : vector<1x1xf32> to vector<1x1x1xf32>
      %c0_29 = arith.constant 0 : index
      %c0_30 = arith.constant 0 : index
      %c0_31 = arith.constant 0 : index
      %33 = vector.load %arg9[%c0_29, %c0_30, %c0_31] : memref<1x1x1xf32, #tpu.memory_space<vmem>>, vector<1x1x1xf32>
      tpu.vector_store %arg9[%c0_29, %c0_30, %c0_31], %32 {strides = array<i32>} : memref<1x1x1xf32, #tpu.memory_space<vmem>>, vector<1x1x1xf32>,
    } else {
    }
    %c0 = arith.constant 0 : index
    %c0_1 = arith.constant 0 : index
    %c0_2 = arith.constant 0 : index
    %c0_3 = arith.constant 0 : index
    %3 = vector.load %arg3[%c0, %c0_1, %c0_2, %c0_3] : memref<1x1x8x128xf32, #tpu.memory_space<vmem>>, vector<1x1x8x128xf32>
    %c0_4 = arith.constant 0 : index
    %c0_5 = arith.constant 0 : index
    %c0_6 = arith.constant 0 : index
    %c0_7 = arith.constant 0 : index
    %4 = vector.load %arg4[%c0_4, %c0_5, %c0_6, %c0_7] : memref<1x1x8x128xf32, #tpu.memory_space<vmem>>, vector<1x1x8x128xf32>
    %5 = arith.subf %3, %4 : vector<1x1x8x128xf32>
    %6 = arith.mulf %5, %5 : vector<1x1x8x128xf32>
    %c0_8 = arith.constant 0 : index
    %c0_9 = arith.constant 0 : index
    %7 = vector.load %arg10[%c0_8, %c0_9] : memref<8x128xf32, #tpu.memory_space<vmem>>, vector<8x128xf32>
    %cst = arith.constant dense<0.000000e+00> : vector<8x128xf32>
    %8 = vector.multi_reduction <add>, %6, %cst [0, 1] : vector<1x1x8x128xf32> to vector<8x128xf32>
    %9 = arith.addf %7, %8 : vector<8x128xf32>
    %c0_10 = arith.constant 0 : index
    %c0_11 = arith.constant 0 : index
    %10 = vector.load %arg10[%c0_10, %c0_11] : memref<8x128xf32, #tpu.memory_space<vmem>>, vector<8x128xf32>
    tpu.vector_store %arg10[%c0_10, %c0_11], %9 {strides = array<i32>} : memref<8x128xf32, #tpu.memory_space<vmem>>, vector<8x128xf32>,
    %c0_i32_12 = arith.constant 0 : i32
    %11 = arith.cmpi eq, %arg1, %c0_i32_12 : i32
    %12 = arith.extui %11 : i1 to i32
    %c0_i32_13 = arith.constant 0 : i32
    %13 = arith.cmpi ne, %12, %c0_i32_13 : i32
    scf.if %13 {
      %c0_14 = arith.constant 0 : index
      %14 = memref.load %arg2[%c0_14] : memref<2xf32, #tpu.memory_space<smem>>
      %c1 = arith.constant 1 : index
      %15 = memref.load %arg2[%c1] : memref<2xf32, #tpu.memory_space<smem>>
      %c0_15 = arith.constant 0 : index
      %c0_16 = arith.constant 0 : index
      %16 = vector.load %arg10[%c0_15, %c0_16] : memref<8x128xf32, #tpu.memory_space<vmem>>, vector<8x128xf32>
      %17 = vector.shape_cast %16 : vector<8x128xf32> to vector<1x8x128xf32>
      %cst_17 = arith.constant dense<0.000000e+00> : vector<1xf32>
      %18 = vector.multi_reduction <add>, %17, %cst_17 [1, 2] : vector<1x8x128xf32> to vector<1xf32>
      %19 = vector.shape_cast %18 : vector<1xf32> to vector<1x1x1xf32>
      %20 = vector.extract %19[0, 0, 0] : f32 from vector<1x1x1xf32>
      %21 = vector.broadcast %20 : f32 to vector<1x1xf32>
      %22 = vector.broadcast %14 : f32 to vector<1x1xf32>
      %23 = arith.mulf %21, %22 : vector<1x1xf32>
      %24 = vector.broadcast %15 : f32 to vector<1x1xf32>
      %25 = arith.subf %24, %23 : vector<1x1xf32>
      %26 = vector.shape_cast %25 : vector<1x1xf32> to vector<1x1x1xf32>
      %c0_18 = arith.constant 0 : index
      %c0_19 = arith.constant 0 : index
      %c0_20 = arith.constant 0 : index
      %27 = vector.load %arg8[%c0_18, %c0_19, %c0_20] : memref<1x1x1xf32, #tpu.memory_space<vmem>>, vector<1x1x1xf32>
      tpu.vector_store %arg8[%c0_18, %c0_19, %c0_20], %26 {strides = array<i32>} : memref<1x1x1xf32, #tpu.memory_space<vmem>>, vector<1x1x1xf32>,
    } else {
    }
    return
  }
  func.func @transform_0(%arg0: i32, %arg1: i32) -> i32 {
    %c0_i32 = arith.constant 0 : i32
    %c0_i32_0 = arith.constant 0 : i32
    return %c0_i32 : i32
  }
  func.func @transform_1(%arg0: i32, %arg1: i32) -> (i32, i32, i32, i32) {
    %c0_i32 = arith.constant 0 : i32
    %c0_i32_0 = arith.constant 0 : i32
    %c0_i32_1 = arith.constant 0 : i32
    return %arg0, %arg1, %c0_i32, %c0_i32_0 : i32, i32, i32, i32
  }
  func.func @transform_2(%arg0: i32, %arg1: i32) -> (i32, i32, i32, i32) {
    %c0_i32 = arith.constant 0 : i32
    %c0_i32_0 = arith.constant 0 : i32
    %c0_i32_1 = arith.constant 0 : i32
    return %arg0, %arg1, %c0_i32, %c0_i32_0 : i32, i32, i32, i32
  }
  func.func @transform_3(%arg0: i32, %arg1: i32) -> (i32, i32, i32) {
    %c0_i32 = arith.constant 0 : i32
    %c0_i32_0 = arith.constant 0 : i32
    %c0_i32_1 = arith.constant 0 : i32
    return %arg0, %c0_i32, %c0_i32_0 : i32, i32, i32
  }
  func.func @transform_4(%arg0: i32, %arg1: i32) -> (i32, i32, i32) {
    %c0_i32 = arith.constant 0 : i32
    %c0_i32_0 = arith.constant 0 : i32
    %c0_i32_1 = arith.constant 0 : i32
    return %arg0, %c0_i32, %c0_i32_0 : i32, i32, i32
  }
  func.func @transform_5(%arg0: i32, %arg1: i32) -> (i32, i32, i32) {
    %c0_i32 = arith.constant 0 : i32
    %c0_i32_0 = arith.constant 0 : i32
    %c0_i32_1 = arith.constant 0 : i32
    return %arg0, %c0_i32, %c0_i32_0 : i32, i32, i32
  }
  func.func @transform_6(%arg0: i32, %arg1: i32) -> (i32, i32, i32) {
    %c0_i32 = arith.constant 0 : i32
    %c0_i32_0 = arith.constant 0 : i32
    %c0_i32_1 = arith.constant 0 : i32
    return %arg0, %c0_i32, %c0_i32_0 : i32, i32, i32
  }
  func.func @transform_7(%arg0: i32, %arg1: i32) -> (i32, i32, i32) {
    %c0_i32 = arith.constant 0 : i32
    %c0_i32_0 = arith.constant 0 : i32
    %c0_i32_1 = arith.constant 0 : i32
    return %arg0, %c0_i32, %c0_i32_0 : i32, i32, i32
  }
}

</mosaic_0001>

<bundles_post_ra>
// kernel: tpu_custom_call.1
= control target key start
LH: loop header
LB: loop body
LE: loop exit
PB: predicated region body
PF: predicated region fallthrough
CT: control target
= control target key end

     0   :  { %s1045_s0 = inlined_call_operand.hbm [shape: f32[2], index: 0, kind: input, shape index: {}]   ;;  %s1046_s1 = inlined_call_operand.hbm [shape: f32[2,1,8,128], index: 1, kind: input, shape index: {}]   ;;  %s1047_s2 = inlined_call_operand.hbm [shape: f32[2,1,8,128], index: 2, kind: input, shape index: {}]   ;;  %s1048_s3 = inlined_call_operand.vmem [shape: f32[2,1,32], index: 3, kind: input, shape index: {}]   ;;  %s1049_s4 = inlined_call_operand.vmem [shape: f32[2,1,32], index: 4, kind: input, shape index: {}]   ;;  %s1050_s5 = inlined_call_operand.vmem [shape: f32[2,1,32], index: 5, kind: input, shape index: {}]   ;;  %s1051_s6 = inlined_call_operand.vmem [shape: f32[2,1,1], index: 6, kind: output, shape index: {0}]   ;;  %s1052_s7 = inlined_call_operand.vmem [shape: f32[2,1,1], index: 7, kind: output, shape index: {1}]  }
   0x1   :  { %1054 = sst [smem:[#allocation13_spill]] %s1045_s0 }
   0x2   :  { %1055 = sst [smem:[#allocation14_spill]] %s1046_s1 }
   0x3   :  { %13 = vsyncpa [#allocation5], 0 }
   0x4   :  { %14 = vsyncpa [#allocation4], 0 }
   0x5   :  { %16 = vsyncpa [#allocation4 + $0x1], 0 }
   0x6   :  { %17 = vsyncpa [#allocation8], 0 }
   0x7   :  { %19 = vsyncpa [#allocation8 + $0x1], 0  ;;  %s885_s24 = smov 0   ;;  %s887_s25 = smov 0  }
   0x8   :  { %s889_s26 = smov 0   ;;  %s891_s27 = smov 0  }
   0x9   :  { %s893_s28 = smov 0   ;;  %s895_s29 = smov 0  }
   0xa LB: > { %s622_s30 = sadd.s32 4294967295, %s840_s29   ;;  %p74_p0 = scmp.ne.s32.totalorder %s828_s26, %s824_s25  ;;  %s840_s29 = sphi %s895_s29, %s25_s29   ;;  %s836_s28 = sphi %s893_s28, %s1068_s28   ;;  %s832_s27 = sphi %s891_s27, %s1067_s27   ;;  %s828_s26 = sphi %s889_s26, %s1066_s26   ;;  %s824_s25 = sphi %s887_s25, %s1065_s25   ;;  %s820_s24 = sphi %s885_s24, %s1064_s24  }
   0xb   : > { %p80_p1 = scmp.ne.s32.totalorder %s824_s25, %s820_s24  ;;  %p917_p2 = scmp.eq.s32.totalorder %s622_s30, 0 }
   0xc   : > { %p624_p3 = scmp.ge.s32.totalorder %s840_s29, 1  ;;  %p249_p4 = scmp.lt.s32.totalorder %s840_s29, 3 }
   0xd   : > { %p925_p5 = por %p917_p2, %p80_p1  ;;  %s37_s11 = sadd.s32 1, %s836_s28 }
   0xe   : > { %p929_p6 = pnand %p624_p3, %p249_p4  ;;  %s67_s12 = sadd.s32 1, %s828_s26 }
   0xf   : > { %p39_p9 = scmp.ge.s32.totalorder %s37_s11, 2  ;;  %p75_p10 = scmp.eq.s32.totalorder %s840_s29, 0 }
  0x10   : > { %p648_p7 = pneg %p929_p6  ;;  %p660_p11 = scmp.lt.s32.totalorder %s840_s29, 2 }
  0x11   : > { %s942_s13 = sand.u32 1, %s828_s26   ;;  %s842_s14 = smov [#allocation3]  }
  0x12   : > { %p649_p8 = pnand %p648_p7, %p917_p2  ;;  %s1059_s0 = sld [smem:[#allocation13_spill]] }
  0x13   : > { %s1070_s11 = smov (%p39_p9, %s37_s11), 0  ;;  %p76_p12 = por %p75_p10, %p74_p0 }
  0x14   : > { %1060 = sst [smem:[#allocation12_spill]] %s1070_s11  ;;  %s62_s17 = ssub.s32 %s836_s28, %s1070_s11 }
  0x15   : > { %s627_s18 = sshll.u32 %s942_s13, 3  ;;  %p65_p13 = scmp.eq.s32.totalorder %s62_s17, 0 }
  0x16   : > { %s628_s19 = sshll.u32 %s836_s28, 7  ;;  %s275_s20 = scalar_lea.vmem [#allocation6], %s627_s18 }
  0x17   : > { %s283_s21 = sshll.u32 %s275_s20, 4  ;;  %s1061_s1 = sld [smem:[#allocation14_spill]]  ;;  %s284_s21 = int_to_ptr.vmem [resolvable:$true] %s283_s21 }
  0x18   : > { %651 = dma.hbm_to_smem (!%p649_p8), %s1059_s0, 16, %s842_s14, [#allocation5]  }
  0x19   : > { %s957_s22 = scalar_select %p65_p13, %s828_s26, %s67_s12  }
  0x1a   : > { %p964_p1 = pnand %p660_p11, %p76_p12  ;;  %s971_s17 = scalar_lea.hbm %s1047_s2, %s628_s19 }
  0x1b   : > { %s294_s20 = scalar_lea.vmem [#allocation7], %s627_s18  ;;  %s272_s0 = scalar_lea.sflag [#allocation4], %s942_s13 }
  0x1c   : > { %s302_s12 = sshll.u32 %s294_s20, 4  ;;  %p728_p0 = pneg %p964_p1  ;;  %s303_s12 = int_to_ptr.vmem [resolvable:$true] %s302_s12 }
  0x1d   : > { %s281_s30 = scalar_lea.hbm %s1061_s1, %s628_s19  ;;  %s739_s23 = scalar_lea.vmem %s284_s21, 128 }
  0x1e   : > { %p740_p3 = scmp.ne.s32.totalorder %s284_s21, %s739_s23  ;;  %s843_s24 = smov [#allocation6]  }
  0x1f   : > { %s744_s1 = sshll.u32 %s843_s24, 4  ;;  %s745_s1 = int_to_ptr.vmem [resolvable:$false] %s744_s1 }
  0x20   : > { %p742_p4 = pnand %p740_p3, %p728_p0  ;;  %s746_s11 = scalar_lea.vmem %s745_s1, 256 }
  0x21   : > { %p747_p8 = scmp.lt.s32.totalorder %s284_s21, %s745_s1  ;;  %p748_p9 = scmp.lt.s32.totalorder %s746_s11, %s739_s23 }
  0x22   : > { %p743_p7 = pneg %p742_p4 }
  0x23   : > { %p749_p10 = por %p748_p9, %p747_p8 }
  0x25   : > { %p750_p11 = pnand %p749_p10, %p743_p7 }
  0x27   : > { %753 = shalt.err (!%p750_p11)
}
  0x28   : > { %655 = dma.hbm_to_vmem [thread:$0]  (!%p964_p1), %s281_s30, 128, %s284_s21, %s272_s0  }
  0x29   : > { %s291_s18 = scalar_lea.sflag [#allocation8], %s942_s13  ;;  %s767_s19 = scalar_lea.vmem %s303_s12, 128 }
  0x2a   : > { %p768_p12 = scmp.ne.s32.totalorder %s303_s12, %s767_s19  ;;  %s844_s15 = smov [#allocation7]  }
  0x2b   : > { %s772_s16 = sshll.u32 %s844_s15, 4  ;;  %s773_s16 = int_to_ptr.vmem [resolvable:$false] %s772_s16 }
  0x2c   : > { %p770_p13 = pnand %p768_p12, %p728_p0  ;;  %s774_s1 = scalar_lea.vmem %s773_s16, 256 }
  0x2d   : > { %p775_p4 = scmp.lt.s32.totalorder %s303_s12, %s773_s16  ;;  %p776_p7 = scmp.lt.s32.totalorder %s774_s1, %s767_s19 }
  0x2e   : > { %p771_p3 = pneg %p770_p13 }
  0x2f   : > { %p777_p8 = por %p776_p7, %p775_p4 }
  0x31   : > { %p778_p9 = pnand %p777_p8, %p771_p3 }
  0x33   : > { %781 = shalt.err (!%p778_p9)
}
  0x34   : > { %658 = dma.hbm_to_vmem [thread:$0]  (!%p964_p1), %s971_s17, 128, %s303_s12, %s291_s18  }
  0x35   : > { %329 = sbr.rel (%p929_p6) target bundleno = 278 (0x116), region = 44 }
  0x3a   : > { %807 = dma.done.wait (%p917_p2), [#allocation5], 16  }
  0x3b   : > { %809 = vsyncadd (%p917_p2), [#allocation5], 4294967280  ;;  %s335_s0 = sand.u32 1, %s824_s25  }
  0x3c   : > { %s633_s11 = sshll.u32 %s335_s0, 3  ;;  %s336_s13 = scalar_lea.sflag [#allocation4], %s335_s0 }
  0x3d   : > { %s339_s21 = scalar_lea.vmem [#allocation6], %s633_s11 }
  0x3e   : > { %811 = dma.done.wait (%p925_p5), %s336_s13, 128  }
  0x3f   : > { %813 = vsyncadd (%p925_p5), %s336_s13, 4294967168  ;;  %s345_s10 = scalar_lea.sflag [#allocation8], %s335_s0  ;;  %s348_s30 = scalar_lea.vmem [#allocation7], %s633_s11 }
  0x40   : > { %815 = dma.done.wait (%p925_p5), %s345_s10, 128  }
  0x41   : > { %817 = vsyncadd (%p925_p5), %s345_s10, 4294967168 }
  0x42   : > { %353 = sfence }
  0x43   : > { %v436_v0 = vld [vmem:[%s339_s21] sm:$0xff]  ;;  %v437_v1 = vld [vmem:[%s348_s30] sm:$0xff]  ;;  %p395_p2 = scmp.lt.s32.totalorder %s832_s27, 1  ;;  %vm430_vm0 = vcmask 253952   ;;  %vm434_vm1 = vcmask 0   ;;  %s447_s1 = sld [smem:[#allocation3]] }
  0x44   : > { %v438_v2 = vsub.f32 %v436_v0, %v437_v1  ;;  %s635_s0 = sld [smem:[#allocation3 + $0x1]] }
  0x45   : > { %s1072_s27 = smov (!%p395_p2, %s832_s27), 1 }
  0x46   : > { %v439_v3 = vmul.f32 %v438_v2, %v438_v2  ;;  %s403_s17 = scalar_lea.vmem %s1050_s5, %s1072_s27  ;;  %s397_s12 = scalar_lea.vmem %s1048_s3, %s1072_s27 }
  0x47   : > { %v417_v4 = vld [vmem:[%s403_s17] sm:$0x1]  ;;  %s400_s18 = scalar_lea.vmem %s1049_s4, %s1072_s27  ;;  %s409_s16 = scalar_lea.vmem %s1052_s7, %s1072_s27 }
  0x48   : > { %450 = vadd.xlane.f32.xlu0 %v439_v3  ;;  %v422_v5 = vmul.f32 %v417_v4, %v417_v4  ;;  %711 = vlog2.f32 %v417_v4  ;;  %v415_v6 = vld [vmem:[%s397_s12] sm:$0x1]  ;;  %s406_s10 = scalar_lea.vmem %s1051_s6, %s1072_s27 }
  0x49   : > { %v416_v7 = vld [vmem:[%s400_s18] sm:$0x1]  ;;  %v419_v9 = vmul.f32 %v415_v6, %v415_v6  ;;  %v460_v28 = vstv %s447_s1 }
  0x4a   : > { %713 = vrcp.f32 %v422_v5  ;;  %v418_v8 = vsub.f32 %v415_v6, %v416_v7  ;;  %v462_v30 = vstv %s635_s0 }
  0x4b   : > { %v420_v13 = vmul.f32 0.5, %v419_v9 }
  0x4c   : > { %v421_v11 = vmul.f32 %v418_v8, %v418_v8 }
  0x55   : > { %v712_v10 = vpop.eup %711 }
  0x56   : > { %v428_v16 = vmul.f32 0.6931472, %v712_v10 }
  0x57   : > { %v714_v12 = vpop.eup %713 }
  0x58   : > { %v424_v14 = vmul.f32 0.5, %v714_v12 }
  0x5a   : > { %v425_v15 = vmul.f32 %v424_v14, %v421_v11 }
  0x5c   : > { %v426_v17 = vsub.f32 %v420_v13, %v425_v15 }
  0x5e   : > { %v429_v18 = vsub.f32 %v426_v17, %v428_v16 }
  0x60   : > { %v431_v19 = vsel %vm430_vm0, %v429_v18, 0.0 }
  0x61   : > { %432 = vadd.xlane.f32.xlu0 %v431_v19 }
  0xd1   : > { %v451_v20 = vpop.xlane.xlu0 %450 }
  0xd2   : > { %v452_v21 = vrot.slane %v451_v20, 4 }
  0xd4   : > { %v453_v22 = vadd.f32 %v452_v21, %v451_v20 }
  0xd6   : > { %v454_v23 = vrot.slane %v453_v22, 2 }
  0xd8   : > { %v455_v24 = vadd.f32 %v454_v23, %v453_v22 }
  0xda   : > { %v456_v25 = vrot.slane %v455_v24, 1 }
  0xdc   : > { %v457_v26 = vadd.f32 %v456_v25, %v455_v24 }
  0xde   : > { %638 = vpush %v457_v26 }
  0xea   : > { %v433_v27 = vpop.xlane.xlu0 %432 }
  0xeb   : > { %435 = vst.msk [vmem:[%s409_s16] sm:$0x1] %vm434_vm1, %v433_v27 }
 0x10f   : > { %s639_s11 = spop %638 }
 0x110   : > { %v459_v29 = vstv %s639_s11 }
 0x111   : > { %v461_v31 = vmul.f32 %v460_v28, %v459_v29 }
 0x113   : > { %v463_v32 = vsub.f32 %v462_v30, %v461_v31 }
 0x115   : > { %465 = vst.msk [vmem:[%s406_s10] sm:$0x1] %vm434_vm1, %v463_v32 }
 0x116 PF: > { %s25_s29 = sadd.s32 1, %s840_s29   ;;  %s1063_s30 = sld [smem:[#allocation12_spill]] }
 0x117   : > { %p22_p5 = scmp.ge.s32.totalorder %s25_s29, 4   ;;  %s1064_s24 = smov %s824_s25 }
 0x118   : > { %s1065_s25 = smov %s828_s26  ;;  %s1066_s26 = smov %s957_s22 }
 0x119   : > { %s1067_s27 = smov %s836_s28  ;;  %24 = sbr.rel (!%p22_p5) target bundleno = 10 (0xa), region = 131 }
 0x11c   : > { %s1068_s28 = smov %s1063_s30 }
 0x11e   :  { %495 = vsyncpa [#allocation4], 1 }
 0x11f   :  { %497 = vsyncpa [#allocation4 + $0x1], 1 }
 0x120   :  { %498 = vsyncpa [#allocation8], 1 }
 0x121   :  { %500 = vsyncpa [#allocation8 + $0x1], 1 }
 0x122   :  { %501 = vsyncpa [#allocation5], 1 }
 0x123   :  { %503 = vsyncpa [#allocation5 + $0x1], 1 }

</bundles_post_ra>
